<compile_context>
chip_gen: v6e
topology: v6e:2x2x1
jax: 0.10.0
libtpu: 0.0.40
codegen_flags: <defaults>
</compile_context>

<pallas_src>
import functools

import jax
import jax.numpy as jnp
from jax.experimental import pallas as pl
from jax.experimental.pallas import tpu as pltpu

TEMPERATURE = 0.07
BASE_TEMPERATURE = 1.0
FMAX = float(jnp.finfo(jnp.float32).max)   # torch.finfo(dtype).max
FEPS = float(jnp.finfo(jnp.float32).eps)   # torch.finfo(dtype).eps


def _make_ws_loss_kernel(tb, b, k, fmax):
    """Build the kernel processing `tb` b1-rows per grid step."""
    inv_t = 1.0 / TEMPERATURE

    def kernel(full_ref, pt_ref, msk_ref,
               logit_ref, conf_ref, tgt_ref, atten_ref, loss_ref, phrase_ref):
        # full_ref  : (tb, b, q, k)  contrastive scores (original dtype)
        # pt_ref    : (tb, q, k)     pseudo targets (original dtype)
        # msk_ref   : (tb, q, k)     x_mask (bool / int)
        # logit_ref : (tb, q, k)     masked diagonal log-softmax ('logit')
        # conf_ref  : (tb, q, k)     confidence ('score')
        # tgt_ref   : (tb, q, k)     masked pseudo target ('target')
        # atten_ref : (tb, q, b*k)   scaled scores 'b1 q (b2 k)' ('atten')
        # loss_ref  : (tb, 1, 1)     per-b1 loss (fully reduced in-kernel)
        # phrase_ref: (tb, 1, 1)     per-b1 phrase count (x_mask[:, :, 0].sum)
        blk = pl.program_id(0)

        @pl.loop(0, tb)   # bounded loop: one row's f32 temp live at a time
        def _(r):
            x = full_ref[r].astype(jnp.float32) * inv_t          # (b, q, k)

            # logsumexp over the joint (b2, k) contrastive axis ("b1 q (b2 k)")
            m = jnp.max(x, axis=2, keepdims=True)                # (b, q, 1)
            m = jnp.max(m, axis=0, keepdims=True)                # (1, q, 1)
            s = jnp.sum(jnp.exp(x - m), axis=2, keepdims=True)
            s = jnp.sum(s, axis=0, keepdims=True)                # (1, q, 1)
            lse = (m + jnp.log(s))[0]                            # (q, 1)

            # 'atten' = rearrange(scores / T, 'b1 b2 q k -> b1 q (b2 k)'),
            # emitted as lane-contiguous slabs (unmasked vst when k % 128 == 0).
            for b2 in range(b):
                atten_ref[r, :, b2 * k:(b2 + 1) * k] = x[b2].astype(atten_ref.dtype)

            # diagonal (b1 == b2) row read straight from the resident block
            # (dynamic leading-axis index; no second DMA of the score tensor).
            xd = full_ref[r, blk * tb + r].astype(jnp.float32) * inv_t   # (q, k)
            logit = xd - lse                                     # (q, k) log-softmax diag

            mraw = msk_ref[r]                                    # (q, k)
            mskb = mraw if mraw.dtype == jnp.bool_ else (mraw != 0)
            pt = jnp.where(mskb, pt_ref[r].astype(jnp.float32), 0.0)

            # per-b1 loss (sum over k lanes, then q sublanes) and phrase count
            lpart = jnp.sum(pt * logit, axis=1, keepdims=True)   # (q, 1)
            loss_ref[r] = -jnp.sum(lpart, axis=0, keepdims=True) # (1, 1)
            mcol = mskb[:, 0:1].astype(jnp.float32)              # (q, 1)
            phrase_ref[r] = jnp.sum(mcol, axis=0, keepdims=True) # (1, 1)

            # confidence (torch.no_grad): mask with -finfo.max, exact softmax
            # over k, re-mask.  Exact divide is hidden under DMA (HBM-bound).
            conf_logit = jnp.where(mskb, logit, -fmax)
            cm = jnp.max(conf_logit, axis=-1, keepdims=True)
            ce = jnp.exp(conf_logit - cm)
            den = jnp.sum(ce, axis=-1, keepdims=True)
            conf = jnp.where(mskb, ce / den, 0.0)

            # PyTorch masks `logit` in place before returning it in the dict.
            logit_ref[r] = conf_logit.astype(logit_ref.dtype)
            conf_ref[r] = conf.astype(conf_ref.dtype)
            tgt_ref[r] = pt.astype(tgt_ref.dtype)

    return kernel


def _vmem_bytes(tb, b, q, k, osz, tsz, msz, asz):
    """Per-step VMEM footprint: double-buffered blocks + bounded f32 temps."""
    in_bytes = (tb * b * q * k * osz        # full score block
                + tb * q * k * tsz          # pseudo target
                + tb * q * k * msz)         # mask
    out_bytes = (2 * tb * q * k * osz       # logit + score
                 + tb * q * k * tsz         # target
                 + tb * q * b * k * asz     # atten
                 + 2 * tb * 4)              # loss + phrase partials
    temps = b * q * k * 4 + 8 * q * k * 4   # one row's f32 slab + (q,k) temps
    return 2 * (in_bytes + out_bytes) + temps


def _chip_info():
    """(vmem_capacity_bytes, tensorcores_per_chip) with safe fallbacks."""
    vmem_cap = None
    try:
        vmem_cap = int(pltpu.get_tpu_info().vmem_capacity_bytes)
    except Exception:
        vmem_cap = None
    kind = ""
    try:
        kind = jax.devices()[0].device_kind.lower()
    except Exception:
        pass
    if vmem_cap is None:
        vmem_cap = (64 << 20) if "v7" in kind else (128 << 20)
    two_core = ("v7" in kind) or ("v4" in kind) or ("v5p" in kind)
    return vmem_cap, (2 if two_core else 1)


def _pick_tb(b, q, k, osz, tsz, msz, asz, budget, num_cores):
    """Largest divisor of b fitting the budget; prefer an even split on 2-TC chips."""
    best = 1
    best_pref = None
    for tb in range(1, b + 1):
        if b % tb:
            continue
        if _vmem_bytes(tb, b, q, k, osz, tsz, msz, asz) > budget:
            continue
        best = tb
        if num_cores <= 1 or (b // tb) % num_cores == 0:
            best_pref = tb       # even split across TensorCores (or single-TC)
    return best_pref if best_pref is not None else best


@functools.partial(jax.jit, static_argnames=("tb", "atten_dtype"))
def ws_loss(output, pseudo_target, x_mask, *, tb=None, atten_dtype=None):
    b, b2_, q, k = output.shape
    if b != b2_:
        raise ValueError("output must have shape (b, b, q, k)")
    out_dt = jnp.dtype(output.dtype)
    tgt_dt = jnp.dtype(pseudo_target.dtype)
    msk_dt = jnp.dtype(x_mask.dtype)
    att_dt = jnp.dtype(atten_dtype) if atten_dtype is not None else out_dt
    fmax = float(jnp.finfo(out_dt).max) if jnp.issubdtype(out_dt, jnp.floating) else FMAX

    vmem_cap, num_cores = _chip_info()
    # Never request all of physical VMEM (headroom for Mosaic scratch/semaphores).
    limit_cap = min((vmem_cap * 7) // 8, 96 << 20)

    if tb is None:
        tb = _pick_tb(b, q, k, out_dt.itemsize, tgt_dt.itemsize, msk_dt.itemsize,
                      att_dt.itemsize, budget=limit_cap - (4 << 20),
                      num_cores=num_cores)
    if b % tb:
        raise ValueError(f"tb={tb} must divide b={b}")
    grid = (b // tb,)

    kernel = _make_ws_loss_kernel(tb, b, k, fmax)

    est = _vmem_bytes(tb, b, q, k, out_dt.itemsize, tgt_dt.itemsize,
                      msk_dt.itemsize, att_dt.itemsize)
    vmem_limit = int(min(max(int(1.3 * est) + (4 << 20), 16 << 20), limit_cap))

    logit, conf, target, atten, loss_part, phrase_part = pl.pallas_call(
        kernel,
        out_shape=(
            jax.ShapeDtypeStruct((b, q, k), out_dt),        # 'logit' (masked)
            jax.ShapeDtypeStruct((b, q, k), out_dt),        # 'score'
            jax.ShapeDtypeStruct((b, q, k), tgt_dt),        # 'target'
            jax.ShapeDtypeStruct((b, q, b * k), att_dt),    # 'atten'  b1 q (b2 k)
            jax.ShapeDtypeStruct((b, 1, 1), jnp.float32),   # per-b1 loss
            jax.ShapeDtypeStruct((b, 1, 1), jnp.float32),   # per-b1 phrase count
        ),
        grid_spec=pltpu.PrefetchScalarGridSpec(
            num_scalar_prefetch=0,
            grid=grid,
            in_specs=[
                pl.BlockSpec((tb, b, q, k), lambda i: (i, 0, 0, 0)),
                pl.BlockSpec((tb, q, k), lambda i: (i, 0, 0)),
                pl.BlockSpec((tb, q, k), lambda i: (i, 0, 0)),
            ],
            out_specs=[
                pl.BlockSpec((tb, q, k), lambda i: (i, 0, 0)),
                pl.BlockSpec((tb, q, k), lambda i: (i, 0, 0)),
                pl.BlockSpec((tb, q, k), lambda i: (i, 0, 0)),
                pl.BlockSpec((tb, q, b * k), lambda i: (i, 0, 0)),
                pl.BlockSpec((tb, 1, 1), lambda i: (i, 0, 0)),
                pl.BlockSpec((tb, 1, 1), lambda i: (i, 0, 0)),
            ],
        ),
        compiler_params=pltpu.CompilerParams(
            dimension_semantics=("parallel",),
            vmem_limit_bytes=vmem_limit),
    )(output, pseudo_target, x_mask)

    # scalar epilogue: b-element reductions only (no full-size XLA passes)
    loss = jnp.sum(loss_part) / (jnp.sum(phrase_part) + FEPS) * BASE_TEMPERATURE

    aux = {
        "loss": loss,
        "atten": atten,
        "logit": logit,
        "target": target,
        "score": conf,
        "temperature": TEMPERATURE,
    }
    return loss, aux


def ws_loss_reference(output, pseudo_target, x_mask):
    """Pure-JAX reference mirroring the PyTorch forward (default args)."""
    b, _, q, k = output.shape
    x = output.astype(jnp.float32) / TEMPERATURE
    atten = jnp.transpose(x, (0, 2, 1, 3)).reshape(b, q, b * k)   # 'b1 q (b2 k)'
    lsm = atten - jax.scipy.special.logsumexp(atten, axis=-1, keepdims=True)
    lsm = jnp.transpose(lsm.reshape(b, q, b, k), (0, 2, 1, 3))    # back to b1 b2 q k
    logit = lsm[jnp.arange(b), jnp.arange(b)]                     # diagonal (b, q, k)
    target = jnp.where(x_mask, pseudo_target.astype(jnp.float32), 0.0)
    loss = -(target * logit).sum(-1)
    phrase = x_mask[:, :, 0].astype(jnp.float32)
    loss = loss.sum() / (phrase.sum() + FEPS) * BASE_TEMPERATURE
    conf_logit = jnp.where(x_mask, logit, -FMAX)
    conf = jax.nn.softmax(conf_logit, axis=-1)
    conf = jnp.where(x_mask, conf, 0.0)
    return {"loss": loss, "atten": atten, "logit": conf_logit,
            "target": target, "score": conf}


if __name__ == "__main__":
    # small shapes consistent with the module: b=2 images, q=8 phrases, k=128 regions
    # (k % 128 == 0 keeps the 'atten' slab stores lane-dense / unmasked)
    b, q, k = 2, 8, 128
    key = jax.random.PRNGKey(0)
    k1, k2, k3 = jax.random.split(key, 3)

    output = jax.random.normal(k1, (b, b, q, k), dtype=jnp.float32)
    pseudo_target = jax.random.uniform(k2, (b, q, k), dtype=jnp.float32)
    x_mask = jax.random.uniform(k3, (b, q, k)) > 0.3   # bool, passed as-is

    ref = ws_loss_reference(output, pseudo_target, x_mask)

    # tb=None -> chip-aware default; tb=1 / tb=b exercise multi-step & single-step paths
    for tb in (None, 1, b):
        loss, aux = ws_loss(output, pseudo_target, x_mask, tb=tb)
        loss, aux = jax.block_until_ready((loss, aux))

        assert jnp.allclose(loss, ref["loss"], rtol=1e-5, atol=1e-5), (tb, loss, ref["loss"])
        assert jnp.allclose(aux["atten"], ref["atten"], rtol=1e-5, atol=1e-5), tb
        assert jnp.allclose(aux["logit"], ref["logit"], rtol=1e-4, atol=1e-4), tb
        assert jnp.allclose(aux["target"], ref["target"], rtol=1e-6, atol=1e-6), tb
        assert jnp.allclose(aux["score"], ref["score"], rtol=1e-4, atol=1e-5), tb

    print("KERNEL_OK")
</pallas_src>

<mosaic_0001>
module attributes {stable_mosaic.version = 11 : i64} {
  func.func @kernel(%arg0: i32, %arg1: memref<2x2x8x128xf32, #tpu.memory_space<vmem>>, %arg2: memref<2x8x128xf32, #tpu.memory_space<vmem>>, %arg3: memref<2x8x128xi32, #tpu.memory_space<vmem>>, %arg4: memref<2x8x128xf32, #tpu.memory_space<vmem>>, %arg5: memref<2x8x128xf32, #tpu.memory_space<vmem>>, %arg6: memref<2x8x128xf32, #tpu.memory_space<vmem>>, %arg7: memref<2x8x256xf32, #tpu.memory_space<vmem>>, %arg8: memref<2x1x1xf32, #tpu.memory_space<vmem>>, %arg9: memref<2x1x1xf32, #tpu.memory_space<vmem>>) attributes {dimension_semantics = [#tpu.dimension_semantics<parallel>], iteration_bounds = array<i64: 1>, scalar_prefetch = 0 : i64, scratch_operands = 0 : i64, tpu.core_type = #tpu.core_type<tc>, window_params = [{transform_indices = @transform_0, window_bounds = array<i64: 2, 2, 8, 128>}, {transform_indices = @transform_1, window_bounds = array<i64: 2, 8, 128>}, {transform_indices = @transform_2, window_bounds = array<i64: 2, 8, 128>}, {transform_indices = @transform_3, window_bounds = array<i64: 2, 8, 128>}, {transform_indices = @transform_4, window_bounds = array<i64: 2, 8, 128>}, {transform_indices = @transform_5, window_bounds = array<i64: 2, 8, 128>}, {transform_indices = @transform_6, window_bounds = array<i64: 2, 8, 256>}, {transform_indices = @transform_7, window_bounds = array<i64: 2, 1, 1>}, {transform_indices = @transform_8, window_bounds = array<i64: 2, 1, 1>}]} {
    %c0_i32 = arith.constant 0 : i32
    %c2_i32 = arith.constant 2 : i32
    %0 = arith.addi %c0_i32, %c2_i32 : i32
    %c1_i32 = arith.constant 1 : i32
    scf.for %arg10 = %c0_i32 to %0 step %c1_i32  : i32 {
      %c1_i32_1 = arith.constant 1 : i32
      %1 = arith.muli %arg10, %c1_i32_1 : i32
      %c0_i32_2 = arith.constant 0 : i32
      %2 = arith.addi %c0_i32_2, %1 : i32
      %3 = arith.index_cast %2 : i32 to index
      %c0 = arith.constant 0 : index
      %c0_3 = arith.constant 0 : index
      %c0_4 = arith.constant 0 : index
      %4 = vector.load %arg1[%3, %c0, %c0_3, %c0_4] : memref<2x2x8x128xf32, #tpu.memory_space<vmem>>, vector<1x2x8x128xf32>
      %5 = vector.shape_cast %4 : vector<1x2x8x128xf32> to vector<2x8x128xf32>
      %cst = arith.constant 14.2857141 : f32
      %6 = vector.broadcast %cst : f32 to vector<2x8x128xf32>
      %7 = arith.mulf %5, %6 : vector<2x8x128xf32>
      %cst_5 = arith.constant dense<0xFF800000> : vector<2x8xf32>
      %8 = vector.multi_reduction <maximumf>, %7, %cst_5 [2] : vector<2x8x128xf32> to vector<2x8xf32>
      %9 = vector.shape_cast %8 : vector<2x8xf32> to vector<2x8x1xf32>
      %cst_6 = arith.constant dense<0xFF800000> : vector<8x1xf32>
      %10 = vector.multi_reduction <maximumf>, %9, %cst_6 [0] : vector<2x8x1xf32> to vector<8x1xf32>
      %11 = vector.shape_cast %10 : vector<8x1xf32> to vector<1x8x1xf32>
      %12 = vector.broadcast %11 : vector<1x8x1xf32> to vector<2x8x128xf32>
      %13 = arith.subf %7, %12 : vector<2x8x128xf32>
      %14 = math.exp %13 : vector<2x8x128xf32>
      %cst_7 = arith.constant dense<0.000000e+00> : vector<2x8xf32>
      %15 = vector.multi_reduction <add>, %14, %cst_7 [2] : vector<2x8x128xf32> to vector<2x8xf32>
      %16 = vector.shape_cast %15 : vector<2x8xf32> to vector<2x8x1xf32>
      %cst_8 = arith.constant dense<0.000000e+00> : vector<8x1xf32>
      %17 = vector.multi_reduction <add>, %16, %cst_8 [0] : vector<2x8x1xf32> to vector<8x1xf32>
      %18 = vector.shape_cast %17 : vector<8x1xf32> to vector<1x8x1xf32>
      %19 = math.log %18 : vector<1x8x1xf32>
      %20 = arith.addf %11, %19 : vector<1x8x1xf32>
      %21 = vector.shape_cast %20 : vector<1x8x1xf32> to vector<8x1xf32>
      %22 = vector.extract_strided_slice %7 {offsets = [0, 0, 0], sizes = [1, 8, 128], strides = [1, 1, 1]} : vector<2x8x128xf32> to vector<1x8x128xf32>
      %23 = vector.shape_cast %22 : vector<1x8x128xf32> to vector<8x128xf32>
      %24 = arith.index_cast %2 : i32 to index
      %c0_9 = arith.constant 0 : index
      %c0_10 = arith.constant 0 : index
      %25 = vector.load %arg7[%24, %c0_9, %c0_10] : memref<2x8x256xf32, #tpu.memory_space<vmem>>, vector<1x8x128xf32>
      %26 = vector.shape_cast %25 : vector<1x8x128xf32> to vector<8x128xf32>
      %27 = vector.shape_cast %23 : vector<8x128xf32> to vector<1x8x128xf32>
      tpu.vector_store %arg7[%24, %c0_9, %c0_10], %27 {strides = array<i32>} : memref<2x8x256xf32, #tpu.memory_space<vmem>>, vector<1x8x128xf32>,
      %28 = vector.extract_strided_slice %7 {offsets = [1, 0, 0], sizes = [1, 8, 128], strides = [1, 1, 1]} : vector<2x8x128xf32> to vector<1x8x128xf32>
      %29 = vector.shape_cast %28 : vector<1x8x128xf32> to vector<8x128xf32>
      %30 = arith.index_cast %2 : i32 to index
      %c0_11 = arith.constant 0 : index
      %c128 = arith.constant 128 : index
      %31 = vector.load %arg7[%30, %c0_11, %c128] : memref<2x8x256xf32, #tpu.memory_space<vmem>>, vector<1x8x128xf32>
      %32 = vector.shape_cast %31 : vector<1x8x128xf32> to vector<8x128xf32>
      %33 = vector.shape_cast %29 : vector<8x128xf32> to vector<1x8x128xf32>
      tpu.vector_store %arg7[%30, %c0_11, %c128], %33 {strides = array<i32>} : memref<2x8x256xf32, #tpu.memory_space<vmem>>, vector<1x8x128xf32>,
      %c2_i32_12 = arith.constant 2 : i32
      %34 = arith.muli %arg0, %c2_i32_12 : i32
      %35 = arith.addi %34, %2 : i32
      %36 = arith.index_cast %2 : i32 to index
      %37 = arith.index_cast %35 : i32 to index
      %c0_13 = arith.constant 0 : index
      %c0_14 = arith.constant 0 : index
      %38 = vector.load %arg1[%36, %37, %c0_13, %c0_14] : memref<2x2x8x128xf32, #tpu.memory_space<vmem>>, vector<1x1x8x128xf32>
      %39 = vector.shape_cast %38 : vector<1x1x8x128xf32> to vector<8x128xf32>
      %cst_15 = arith.constant 14.2857141 : f32
      %40 = vector.broadcast %cst_15 : f32 to vector<8x128xf32>
      %41 = arith.mulf %39, %40 : vector<8x128xf32>
      %42 = vector.broadcast %21 : vector<8x1xf32> to vector<8x128xf32>
      %43 = arith.subf %41, %42 : vector<8x128xf32>
      %44 = arith.index_cast %2 : i32 to index
      %c0_16 = arith.constant 0 : index
      %c0_17 = arith.constant 0 : index
      %45 = vector.load %arg3[%44, %c0_16, %c0_17] : memref<2x8x128xi32, #tpu.memory_space<vmem>>, vector<1x8x128xi32>
      %46 = vector.shape_cast %45 : vector<1x8x128xi32> to vector<8x128xi32>
      %cst_18 = arith.constant dense<0> : vector<8x128xi32>
      %47 = arith.cmpi ne, %46, %cst_18 : vector<8x128xi32>
      %48 = arith.index_cast %2 : i32 to index
      %c0_19 = arith.constant 0 : index
      %c0_20 = arith.constant 0 : index
      %49 = vector.load %arg2[%48, %c0_19, %c0_20] : memref<2x8x128xf32, #tpu.memory_space<vmem>>, vector<1x8x128xf32>
      %50 = vector.shape_cast %49 : vector<1x8x128xf32> to vector<8x128xf32>
      %cst_21 = arith.constant 0.000000e+00 : f32
      %51 = vector.broadcast %cst_21 : f32 to vector<8x128xf32>
      %52 = arith.select %47, %50, %51 : vector<8x128xi1>, vector<8x128xf32>
      %53 = arith.mulf %52, %43 : vector<8x128xf32>
      %cst_22 = arith.constant dense<0.000000e+00> : vector<8xf32>
      %54 = vector.multi_reduction <add>, %53, %cst_22 [1] : vector<8x128xf32> to vector<8xf32>
      %55 = vector.shape_cast %54 : vector<8xf32> to vector<8x1xf32>
      %cst_23 = arith.constant dense<0.000000e+00> : vector<1xf32>
      %56 = vector.multi_reduction <add>, %55, %cst_23 [0] : vector<8x1xf32> to vector<1xf32>
      %57 = vector.shape_cast %56 : vector<1xf32> to vector<1x1xf32>
      %cst_24 = arith.constant 0.000000e+00 : f32
      %58 = vector.broadcast %cst_24 : f32 to vector<1x1xf32>
      %59 = arith.subf %58, %57 : vector<1x1xf32>
      %60 = arith.index_cast %2 : i32 to index
      %c0_25 = arith.constant 0 : index
      %c0_26 = arith.constant 0 : index
      %61 = vector.load %arg8[%60, %c0_25, %c0_26] : memref<2x1x1xf32, #tpu.memory_space<vmem>>, vector<1x1x1xf32>
      %62 = vector.shape_cast %61 : vector<1x1x1xf32> to vector<1x1xf32>
      %63 = vector.shape_cast %59 : vector<1x1xf32> to vector<1x1x1xf32>
      tpu.vector_store %arg8[%60, %c0_25, %c0_26], %63 {strides = array<i32>} : memref<2x1x1xf32, #tpu.memory_space<vmem>>, vector<1x1x1xf32>,
      %64 = vector.extract_strided_slice %47 {offsets = [0, 0], sizes = [8, 1], strides = [1, 1]} : vector<8x128xi1> to vector<8x1xi1>
      %65 = arith.extui %64 : vector<8x1xi1> to vector<8x1xi32>
      %66 = arith.sitofp %65 : vector<8x1xi32> to vector<8x1xf32>
      %cst_27 = arith.constant dense<0.000000e+00> : vector<1xf32>
      %67 = vector.multi_reduction <add>, %66, %cst_27 [0] : vector<8x1xf32> to vector<1xf32>
      %68 = vector.shape_cast %67 : vector<1xf32> to vector<1x1xf32>
      %69 = arith.index_cast %2 : i32 to index
      %c0_28 = arith.constant 0 : index
      %c0_29 = arith.constant 0 : index
      %70 = vector.load %arg9[%69, %c0_28, %c0_29] : memref<2x1x1xf32, #tpu.memory_space<vmem>>, vector<1x1x1xf32>
      %71 = vector.shape_cast %70 : vector<1x1x1xf32> to vector<1x1xf32>
      %72 = vector.shape_cast %68 : vector<1x1xf32> to vector<1x1x1xf32>
      tpu.vector_store %arg9[%69, %c0_28, %c0_29], %72 {strides = array<i32>} : memref<2x1x1xf32, #tpu.memory_space<vmem>>, vector<1x1x1xf32>,
      %cst_30 = arith.constant -3.40282347E+38 : f32
      %73 = vector.broadcast %cst_30 : f32 to vector<8x128xf32>
      %74 = arith.select %47, %43, %73 : vector<8x128xi1>, vector<8x128xf32>
      %cst_31 = arith.constant dense<0xFF800000> : vector<8xf32>
      %75 = vector.multi_reduction <maximumf>, %74, %cst_31 [1] : vector<8x128xf32> to vector<8xf32>
      %76 = vector.shape_cast %75 : vector<8xf32> to vector<8x1xf32>
      %77 = vector.broadcast %76 : vector<8x1xf32> to vector<8x128xf32>
      %78 = arith.subf %74, %77 : vector<8x128xf32>
      %79 = math.exp %78 : vector<8x128xf32>
      %cst_32 = arith.constant dense<0.000000e+00> : vector<8xf32>
      %80 = vector.multi_reduction <add>, %79, %cst_32 [1] : vector<8x128xf32> to vector<8xf32>
      %81 = vector.shape_cast %80 : vector<8xf32> to vector<8x1xf32>
      %82 = vector.broadcast %81 : vector<8x1xf32> to vector<8x128xf32>
      %83 = arith.divf %79, %82 : vector<8x128xf32>
      %cst_33 = arith.constant 0.000000e+00 : f32
      %84 = vector.broadcast %cst_33 : f32 to vector<8x128xf32>
      %85 = arith.select %47, %83, %84 : vector<8x128xi1>, vector<8x128xf32>
      %86 = arith.index_cast %2 : i32 to index
      %c0_34 = arith.constant 0 : index
      %c0_35 = arith.constant 0 : index
      %87 = vector.load %arg4[%86, %c0_34, %c0_35] : memref<2x8x128xf32, #tpu.memory_space<vmem>>, vector<1x8x128xf32>
      %88 = vector.shape_cast %87 : vector<1x8x128xf32> to vector<8x128xf32>
      %89 = vector.shape_cast %74 : vector<8x128xf32> to vector<1x8x128xf32>
      tpu.vector_store %arg4[%86, %c0_34, %c0_35], %89 {strides = array<i32>} : memref<2x8x128xf32, #tpu.memory_space<vmem>>, vector<1x8x128xf32>,
      %90 = arith.index_cast %2 : i32 to index
      %c0_36 = arith.constant 0 : index
      %c0_37 = arith.constant 0 : index
      %91 = vector.load %arg5[%90, %c0_36, %c0_37] : memref<2x8x128xf32, #tpu.memory_space<vmem>>, vector<1x8x128xf32>
      %92 = vector.shape_cast %91 : vector<1x8x128xf32> to vector<8x128xf32>
      %93 = vector.shape_cast %85 : vector<8x128xf32> to vector<1x8x128xf32>
      tpu.vector_store %arg5[%90, %c0_36, %c0_37], %93 {strides = array<i32>} : memref<2x8x128xf32, #tpu.memory_space<vmem>>, vector<1x8x128xf32>,
      %94 = arith.index_cast %2 : i32 to index
      %c0_38 = arith.constant 0 : index
      %c0_39 = arith.constant 0 : index
      %95 = vector.load %arg6[%94, %c0_38, %c0_39] : memref<2x8x128xf32, #tpu.memory_space<vmem>>, vector<1x8x128xf32>
      %96 = vector.shape_cast %95 : vector<1x8x128xf32> to vector<8x128xf32>
      %97 = vector.shape_cast %52 : vector<8x128xf32> to vector<1x8x128xf32>
      tpu.vector_store %arg6[%94, %c0_38, %c0_39], %97 {strides = array<i32>} : memref<2x8x128xf32, #tpu.memory_space<vmem>>, vector<1x8x128xf32>,
    }
    %c2_i32_0 = arith.constant 2 : i32
    return
  }
  func.func @transform_0(%arg0: i32) -> (i32, i32, i32, i32) {
    %c0_i32 = arith.constant 0 : i32
    %c0_i32_0 = arith.constant 0 : i32
    %c0_i32_1 = arith.constant 0 : i32
    %c0_i32_2 = arith.constant 0 : i32
    return %arg0, %c0_i32, %c0_i32_0, %c0_i32_1 : i32, i32, i32, i32
  }
  func.func @transform_1(%arg0: i32) -> (i32, i32, i32) {
    %c0_i32 = arith.constant 0 : i32
    %c0_i32_0 = arith.constant 0 : i32
    %c0_i32_1 = arith.constant 0 : i32
    return %arg0, %c0_i32, %c0_i32_0 : i32, i32, i32
  }
  func.func @transform_2(%arg0: i32) -> (i32, i32, i32) {
    %c0_i32 = arith.constant 0 : i32
    %c0_i32_0 = arith.constant 0 : i32
    %c0_i32_1 = arith.constant 0 : i32
    return %arg0, %c0_i32, %c0_i32_0 : i32, i32, i32
  }
  func.func @transform_3(%arg0: i32) -> (i32, i32, i32) {
    %c0_i32 = arith.constant 0 : i32
    %c0_i32_0 = arith.constant 0 : i32
    %c0_i32_1 = arith.constant 0 : i32
    return %arg0, %c0_i32, %c0_i32_0 : i32, i32, i32
  }
  func.func @transform_4(%arg0: i32) -> (i32, i32, i32) {
    %c0_i32 = arith.constant 0 : i32
    %c0_i32_0 = arith.constant 0 : i32
    %c0_i32_1 = arith.constant 0 : i32
    return %arg0, %c0_i32, %c0_i32_0 : i32, i32, i32
  }
  func.func @transform_5(%arg0: i32) -> (i32, i32, i32) {
    %c0_i32 = arith.constant 0 : i32
    %c0_i32_0 = arith.constant 0 : i32
    %c0_i32_1 = arith.constant 0 : i32
    return %arg0, %c0_i32, %c0_i32_0 : i32, i32, i32
  }
  func.func @transform_6(%arg0: i32) -> (i32, i32, i32) {
    %c0_i32 = arith.constant 0 : i32
    %c0_i32_0 = arith.constant 0 : i32
    %c0_i32_1 = arith.constant 0 : i32
    return %arg0, %c0_i32, %c0_i32_0 : i32, i32, i32
  }
  func.func @transform_7(%arg0: i32) -> (i32, i32, i32) {
    %c0_i32 = arith.constant 0 : i32
    %c0_i32_0 = arith.constant 0 : i32
    %c0_i32_1 = arith.constant 0 : i32
    return %arg0, %c0_i32, %c0_i32_0 : i32, i32, i32
  }
  func.func @transform_8(%arg0: i32) -> (i32, i32, i32) {
    %c0_i32 = arith.constant 0 : i32
    %c0_i32_0 = arith.constant 0 : i32
    %c0_i32_1 = arith.constant 0 : i32
    return %arg0, %c0_i32, %c0_i32_0 : i32, i32, i32
  }
}

</mosaic_0001>

<bundles_post_ra>
// kernel: ws_loss.1
= control target key start
LH: loop header
LB: loop body
LE: loop exit
PB: predicated region body
PF: predicated region fallthrough
CT: control target
= control target key end

     0   :  { %14 = vsyncpa [#allocation3], 0  ;;  %s503_s0 = inlined_call_operand.hbm [shape: f32[2,2,8,128], index: 0, kind: input, shape index: {}]   ;;  %s504_s1 = inlined_call_operand.vmem [shape: f32[2,8,128], index: 1, kind: input, shape index: {}]   ;;  %s505_s2 = inlined_call_operand.vmem [shape: s32[2,8,128], index: 2, kind: input, shape index: {}]   ;;  %s506_s3 = inlined_call_operand.hbm [shape: f32[2,8,128], index: 3, kind: output, shape index: {0}]   ;;  %s507_s4 = inlined_call_operand.hbm [shape: f32[2,8,128], index: 4, kind: output, shape index: {1}]   ;;  %s508_s5 = inlined_call_operand.hbm [shape: f32[2,8,128], index: 5, kind: output, shape index: {2}]   ;;  %s509_s6 = inlined_call_operand.hbm [shape: f32[2,8,256], index: 6, kind: output, shape index: {3}]   ;;  %s510_s7 = inlined_call_operand.vmem [shape: f32[2,1,1], index: 7, kind: output, shape index: {4}]   ;;  %s511_s8 = inlined_call_operand.vmem [shape: f32[2,1,1], index: 8, kind: output, shape index: {5}]  }
   0x1   :  { %15 = vsyncpa [#allocation4], 0 }
   0x2   :  { %16 = vsyncpa [#allocation7], 0 }
   0x3   :  { %17 = vsyncpa [#allocation10], 0  ;;  %s378_s27 = smov [#allocation2]  }
   0x4   :  { %s23_s28 = sshll.u32 %s378_s27, 4  ;;  %s24_s28 = int_to_ptr.vmem [resolvable:$true] %s23_s28 }
   0x5   :  { %s270_s29 = scalar_lea.vmem %s24_s28, 512  ;;  %p275_p1 = scmp.lt.s32.totalorder %s24_s28, %s24_s28 }
   0x6   :  { %p271_p0 = scmp.ne.s32.totalorder %s24_s28, %s270_s29  ;;  %p276_p2 = scmp.lt.s32.totalorder %s270_s29, %s270_s29 }
   0x8   :  { %p277_p3 = por %p276_p2, %p275_p1 }
   0xa   :  { %p278_p4 = pnand %p277_p3, %p271_p0 }
   0xc   :  { %281 = shalt.err (!%p278_p4)
}
   0xd   :  { %s379_s30 = smov 128   ;;  %s380_s9 = smov 8  }
   0xe   :  { %29 = dma.hbm_to_vmem [thread:$0]  %s503_s0, 512, %s24_s28, [#allocation3], %s379_s30, %s379_s30, %s380_s9  }
   0xf   :  { %366 = dma.done.wait [#allocation3], 512  }
  0x10   :  { %367 = vsyncadd [#allocation3], 4294966784  ;;  %s439_s12 = smov 0  }
  0x11 LB: > { %s445_s13 = sshll.u32 %s376_s12, 4  ;;  %s450_s15 = sshll.u32 %s376_s12, 3  ;;  %v381_v19 = vmov 0.0   ;;  %vm103_vm1 = vcmask 7168   ;;  %vm99_vm2 = vcmask 0   ;;  %s376_s12 = sphi %s439_s12, %s42_s12  }
  0x12   : > { %s44_s14 = scalar_lea.vmem [#allocation2], %s445_s13  ;;  %s70_s0 = scalar_lea.vmem [#allocation9], %s445_s13 }
  0x13   : > { %v45_v0 = vld [vmem:[%s44_s14] sm:$0xff]  ;;  %v46_v1 = vld [vmem:[%s44_s14 + $0x8] sm:$0xff]  ;;  %s82_s18 = scalar_lea.vmem %s505_s2, %s450_s15  ;;  %s85_s21 = scalar_lea.vmem %s504_s1, %s450_s15 }
  0x14   : > { %v47_v2 = vmul.f32 14.285714, %v45_v0  ;;  %v48_v3 = vmul.f32 14.285714, %v46_v1  ;;  %v83_v13 = vld [vmem:[%s82_s18] sm:$0xff]  ;;  %s128_s22 = scalar_lea.vmem [#allocation8], %s450_s15  ;;  %s76_s23 = sadd.s32 %s450_s15, %s445_s13 }
  0x15   : > { %vm84_vm0 = vcmp.ne.s32.totalorder %v83_v13, 0  ;;  %v86_v14 = vld [vmem:[%s85_s21] sm:$0xff]  ;;  %s77_s24 = scalar_lea.vmem [#allocation2], %s76_s23  ;;  %s124_s25 = scalar_lea.vmem [#allocation5], %s450_s15 }
  0x16   : > { %49 = vmax.xlane.f32.xlu0 %v47_v2  ;;  %71 = vst [vmem:[%s70_s0] sm:$0xff] %v47_v2  ;;  %72 = vst [vmem:[%s70_s0 + $0x8] sm:$0xff] %v48_v3  ;;  %v87_v15 = vsel %vm84_vm0, %v86_v14, 0.0  ;;  %v232_v20 = vsel %vm84_vm0, 1.0, %v381_v19  ;;  %v78_v22 = vld [vmem:[%s77_s24] sm:$0xff]  ;;  %s111_s28 = scalar_lea.vmem %s511_s8, %s376_s12  ;;  %s98_s11 = scalar_lea.vmem %s510_s7, %s376_s12 }
  0x17   : > { %129 = vst [vmem:[%s128_s22] sm:$0xff] %v87_v15  ;;  %v104_v21 = vsel %vm103_vm1, %v232_v20, 0.0  ;;  %v79_v26 = vmul.f32 14.285714, %v78_v22  ;;  %s126_s13 = scalar_lea.vmem [#allocation6], %s450_s15  ;;  %s42_s12 = sadd.s32 1, %s376_s12  }
  0x18   : > { %v105_v23 = vrot.slane %v104_v21, 4  ;;  %p39_p5 = scmp.ge.s32.totalorder %s42_s12, 2  }
  0x19   :  { %s382_s14 = smov (%p39_p5), [#allocation6]   ;;  %s383_s16 = smov (%p39_p5), [#allocation5]  }
  0x1a   : > { %51 = vmax.xlane.f32.xlu0 %v48_v3  ;;  %v106_v28 = vadd.f32 %v105_v23, %v104_v21  ;;  %s147_s0 = sshll.u32 (%p39_p5), %s382_s14, 4  ;;  %s135_s17 = sshll.u32 (%p39_p5), %s383_s16, 4  ;;  %s148_s0 = int_to_ptr.vmem [resolvable:$true] %s147_s0  ;;  %s136_s17 = int_to_ptr.vmem [resolvable:$true] %s135_s17 }
  0x1b   :  { %s282_s18 = scalar_lea.vmem (%p39_p5), %s148_s0, 256  ;;  %p287_p7 = scmp.lt.s32.totalorder (%p39_p5), %s148_s0, %s148_s0 }
  0x1c   : > { %v107_v30 = vrot.slane %v106_v28, 2  ;;  %p283_p6 = scmp.ne.s32.totalorder (%p39_p5), %s148_s0, %s282_s18  ;;  %p288_p8 = scmp.lt.s32.totalorder (%p39_p5), %s282_s18, %s282_s18 }
  0x1e   : > { %v108_v33 = vadd.f32 %v107_v30, %v106_v28  ;;  %p289_p9 = por (%p39_p5), %p288_p8, %p287_p7 }
  0x20   : > { %v109_v34 = vrot.slane %v108_v33, 1  ;;  %p290_p10 = pnand (%p39_p5), %p289_p9, %p283_p6 }
  0x22   : > { %v110_v35 = vadd.f32 %v109_v34, %v108_v33 }
  0x24   : > { %112 = vst.msk [vmem:[%s111_s28] sm:$0x1] %vm99_vm2, %v110_v35 }
  0x9f   : > { %v50_v4 = vpop.xlane.xlu0 %49 }
  0xa3   : > { %v52_v5 = vpop.xlane.xlu0 %51 }
  0xa4   : > { %v53_v6 = vmax.f32 %v50_v4, %v52_v5 }
  0xa6   : > { %v54_v7 = vsub.f32 %v47_v2, %v53_v6  ;;  %v55_v8 = vsub.f32 %v48_v3, %v53_v6 }
  0xa8   : > { %v56_v9 = vmul.f32 1.442695, %v54_v7  ;;  %v58_v10 = vmul.f32 1.442695, %v55_v8 }
  0xaa   : > { %252 = vpow2.f32 %v56_v9 }
  0xab   : > { %254 = vpow2.f32 %v58_v10 }
  0xb7   : > { %v253_v11 = vpop.eup %252 }
  0xb8   : > { %60 = vadd.xlane.f32.xlu1 %v253_v11  ;;  %v255_v12 = vpop.eup %254 }
  0xbc   : > { %62 = vadd.xlane.f32.xlu1 %v255_v12 }
 0x141   : > { %v61_v16 = vpop.xlane.xlu1 %60 }
 0x145   : > { %v63_v17 = vpop.xlane.xlu1 %62 }
 0x146   : > { %v64_v18 = vadd.f32 %v63_v17, %v61_v16 }
 0x148   : > { %256 = vlog2.f32 %v64_v18 }
 0x155   : > { %v257_v24 = vpop.eup %256 }
 0x156   : > { %v66_v25 = vmul.f32 0.6931472, %v257_v24 }
 0x158   : > { %v67_v27 = vadd.f32 %v66_v25, %v53_v6 }
 0x15a   : > { %v80_v29 = vsub.f32 %v79_v26, %v67_v27 }
 0x15c   : > { %v113_v31 = vsel %vm84_vm0, %v80_v29, -3.4028235e+38  ;;  %v88_v32 = vmul.f32 %v87_v15, %v80_v29 }
 0x15d   : > { %114 = vmax.xlane.f32.xlu0 %v113_v31  ;;  %125 = vst [vmem:[%s124_s25] sm:$0xff] %v113_v31 }
 0x161   : > { %89 = vadd.xlane.f32.xlu0 %v88_v32 }
 0x1e6   : > { %v115_v36 = vpop.xlane.xlu0 %114 }
 0x1e7   : > { %v116_v37 = vsub.f32 %v113_v31, %v115_v36 }
 0x1e9   : > { %v117_v38 = vmul.f32 1.442695, %v116_v37 }
 0x1ea   : > { %v90_v39 = vpop.xlane.xlu0 %89 }
 0x1eb   : > { %258 = vpow2.f32 %v117_v38  ;;  %v91_v40 = vrot.slane %v90_v39, 4 }
 0x1ed   : > { %v92_v41 = vadd.f32 %v91_v40, %v90_v39 }
 0x1ef   : > { %v93_v42 = vrot.slane %v92_v41, 2 }
 0x1f1   : > { %v94_v43 = vadd.f32 %v93_v42, %v92_v41 }
 0x1f3   : > { %v95_v44 = vrot.slane %v94_v43, 1 }
 0x1f5   : > { %v96_v45 = vadd.f32 %v95_v44, %v94_v43 }
 0x1f7   : > { %v97_v46 = vsub.f32 0.0, %v96_v45 }
 0x1f8   : > { %v259_v47 = vpop.eup %258 }
 0x1f9   : > { %100 = vst.msk [vmem:[%s98_s11] sm:$0x1] %vm99_vm2, %v97_v46  ;;  %119 = vadd.xlane.f32.xlu1 %v259_v47 }
 0x282   : > { %v120_v48 = vpop.xlane.xlu1 %119 }
 0x283   : > { %260 = vrcp.f32 %v120_v48 }
 0x290   : > { %v261_v49 = vpop.eup %260  ;;  %41 = sbr.rel (!%p39_p5) target bundleno = 17 (0x11), region = 93 }
 0x291   : > { %v122_v50 = vmul.f32 %v261_v49, %v259_v47 }
 0x293   : > { %v123_v51 = vsel %vm84_vm0, %v122_v50, 0.0 }
 0x294   : > { %127 = vst [vmem:[%s126_s13] sm:$0xff] %v123_v51 }
 0x295   :  { %293 = shalt.err (!%p290_p10)
}
 0x296   :  { %153 = dma.vmem_to_hbm [thread:$0]  %s148_s0, 256, %s507_s4, [#allocation7], %s379_s30, %s379_s30, %s380_s9  }
 0x297   :  { %s302_s1 = scalar_lea.vmem %s136_s17, 256  ;;  %p307_p12 = scmp.lt.s32.totalorder %s136_s17, %s136_s17 }
 0x298   :  { %p303_p11 = scmp.ne.s32.totalorder %s136_s17, %s302_s1  ;;  %p308_p13 = scmp.lt.s32.totalorder %s302_s1, %s302_s1 }
 0x29a   :  { %p309_p0 = por %p308_p13, %p307_p12 }
 0x29c   :  { %p310_p1 = pnand %p309_p0, %p303_p11 }
 0x29e   :  { %313 = shalt.err (!%p310_p1)
}
 0x29f   :  { %141 = dma.vmem_to_hbm [thread:$0]  %s136_s17, 256, %s506_s3, [#allocation4], %s379_s30, %s379_s30, %s380_s9  }
 0x2a0   :  { %s384_s8 = smov [#allocation8]   ;;  %s385_s20 = smov [#allocation9]  }
 0x2a1   :  { %s159_s12 = sshll.u32 %s384_s8, 4  ;;  %s171_s21 = sshll.u32 %s385_s20, 4  ;;  %s160_s12 = int_to_ptr.vmem [resolvable:$true] %s159_s12  ;;  %s172_s21 = int_to_ptr.vmem [resolvable:$true] %s171_s21 }
 0x2a2   :  { %s322_s4 = scalar_lea.vmem %s160_s12, 256  ;;  %p327_p3 = scmp.lt.s32.totalorder %s160_s12, %s160_s12 }
 0x2a3   :  { %p323_p2 = scmp.ne.s32.totalorder %s160_s12, %s322_s4  ;;  %p328_p4 = scmp.lt.s32.totalorder %s322_s4, %s322_s4 }
 0x2a5   :  { %p329_p5 = por %p328_p4, %p327_p3 }
 0x2a7   :  { %p330_p6 = pnand %p329_p5, %p323_p2 }
 0x2a9   :  { %333 = shalt.err (!%p330_p6)
}
 0x2aa   :  { %165 = dma.vmem_to_hbm [thread:$0]  %s160_s12, 256, %s508_s5, [#allocation7], %s379_s30, %s379_s30, %s380_s9  }
 0x2ab   :  { %s342_s3 = scalar_lea.vmem %s172_s21, 512  ;;  %p347_p8 = scmp.lt.s32.totalorder %s172_s21, %s172_s21 }
 0x2ac   :  { %p343_p7 = scmp.ne.s32.totalorder %s172_s21, %s342_s3  ;;  %p348_p9 = scmp.lt.s32.totalorder %s342_s3, %s342_s3 }
 0x2ae   :  { %p349_p10 = por %p348_p9, %p347_p8 }
 0x2b0   :  { %p350_p11 = pnand %p349_p10, %p343_p7 }
 0x2b2   :  { %353 = shalt.err (!%p350_p11)
}
 0x2b3   :  { %s386_s24 = smov 256   ;;  %s387_s25 = smov 16  }
 0x2b4   :  { %177 = dma.vmem_to_hbm [thread:$0]  %s172_s21, 512, %s509_s6, [#allocation10], %s386_s24, %s386_s24, %s387_s25  }
 0x2b5   :  { %368 = dma.done.wait [#allocation4], 256  }
 0x2b6   :  { %369 = vsyncadd [#allocation4], 4294967040 }
 0x2b7   :  { %370 = dma.done.wait [#allocation7], 512  }
 0x2b8   :  { %371 = vsyncadd [#allocation7], 4294966784 }
 0x2b9   :  { %372 = dma.done.wait [#allocation10], 512  }
 0x2ba   :  { %373 = vsyncadd [#allocation10], 4294966784 }
 0x2bb   :  { %198 = vsyncpa [#allocation3], 1 }
 0x2bc   :  { %199 = vsyncpa [#allocation4], 1 }
 0x2bd   :  { %200 = vsyncpa [#allocation7], 1 }
 0x2be   :  { %201 = vsyncpa [#allocation10], 1 }

</bundles_post_ra>
